<compile_context>
chip_gen: v7x
topology: tpu7x:2x2x1
jax: 0.10.0
libtpu: 0.0.40
codegen_flags: <defaults>
</compile_context>

<pallas_src>
import functools

import jax
import jax.numpy as jnp
import numpy as np
from jax.experimental import pallas as pl
from jax.experimental.pallas import tpu as pltpu


# ---------------------------------------------------------------------------
# Kernel: fused global mean + global max over the spatial axis.
#   x2d: (N*C, S) rows = (n, c), lanes = flattened D*H*W (lane-dense reads of NCDHW).
#   Grid = (row_tiles, spatial_chunks); spatial axis is the reduction ("arbitrary").
# ---------------------------------------------------------------------------
def _pool_kernel(x_ref, o_ref, sum_acc, max_acc, *,
                 inv_s, s_total, ts, need_mask, acc_lanes):
    j = pl.program_id(1)
    nj = pl.num_programs(1)

    @pl.when(j == 0)
    def _init():
        sum_acc[...] = jnp.zeros_like(sum_acc)
        max_acc[...] = jnp.full_like(max_acc, -jnp.inf)

    chunk = x_ref[...].astype(jnp.float32)          # (tmr, ts)

    def accumulate(sum_chunk, max_chunk):
        if acc_lanes == 128:
            # VPU-only fold of ts lanes down to 128 lanes: one add + one max per input
            # vreg, 128-aligned static slices (free), no per-chunk XLU cross-lane reduce,
            # and full-width (unmasked) accumulator stores.
            s = sum_chunk[:, 0:128]
            m = max_chunk[:, 0:128]
            for k in range(1, ts // 128):
                sl = slice(k * 128, (k + 1) * 128)
                s = s + sum_chunk[:, sl]
                m = jnp.maximum(m, max_chunk[:, sl])
        else:
            # Single full-width chunk whose width is not a multiple of 128: reduce it
            # all the way (this path runs exactly once per row tile).
            s = jnp.sum(sum_chunk, axis=1, keepdims=True)
            m = jnp.max(max_chunk, axis=1, keepdims=True)
        sum_acc[...] += s
        max_acc[...] = jnp.maximum(max_acc[...], m)

    if need_mask:
        # Only the LAST spatial chunk contains lane padding -> predicate the masked path.
        @pl.when(j < nj - 1)
        def _body():
            accumulate(chunk, chunk)

        @pl.when(j == nj - 1)
        def _tail():
            col = jax.lax.broadcasted_iota(jnp.int32, chunk.shape, 1) + j * ts
            valid = col < s_total
            accumulate(jnp.where(valid, chunk, 0.0),
                       jnp.where(valid, chunk, -jnp.inf))
    else:
        accumulate(chunk, chunk)

    @pl.when(j == nj - 1)
    def _finalize():
        if acc_lanes == 128:
            pooled = (jnp.sum(sum_acc[...], axis=1, keepdims=True) * inv_s
                      + jnp.max(max_acc[...], axis=1, keepdims=True))
        else:
            pooled = sum_acc[...] * inv_s + max_acc[...]
        o_ref[...] = pooled.astype(o_ref.dtype)      # (tmr, 1): mean + max per row


def global_mean_plus_max(x2d):
    """x2d: (N*C, S) -> (N*C, 1) with mean(row) + max(row), f32."""
    NC, S = x2d.shape
    itemsize = x2d.dtype.itemsize

    # Sublane packing requirement for the row-tile size: 8 (f32), 16 (bf16), 32 (int8/fp8).
    sub = 8 * max(1, 4 // itemsize)

    # --- Row tiling: guarantee >= 2 "parallel" row tiles (v7x 2-TC load balance) whenever
    #     there are enough rows; cap at 256 rows so the spatial chunk stays >= 512 lanes.
    #     A ragged last row tile is fine: Pallas clips the out-of-range rows on writeback.
    if NC <= 2 * sub:
        tmr = NC                                     # full-extent tile (always legal)
    else:
        half = (NC + 1) // 2
        tmr = min(256, ((half + sub - 1) // sub) * sub)
    n_row = pl.cdiv(NC, tmr)

    # --- Spatial chunking: ~2 MiB per input block (double-buffered -> ~4 MiB, well inside
    #     scoped-VMEM defaults on v5e/v6e/v7x), lanes a multiple of 128.
    budget = 2 * 1024 * 1024
    max_ts = (budget // (tmr * itemsize)) // 128 * 128
    max_ts = max(128, min(max_ts, 16384))
    if S <= max_ts:
        ts, n_sp, need_mask = S, 1, False            # full-width block (always legal)
    else:
        ts = max_ts
        n_sp = pl.cdiv(S, ts)
        need_mask = (S % ts) != 0
    acc_lanes = 128 if ts % 128 == 0 else 1

    kernel = functools.partial(
        _pool_kernel, inv_s=1.0 / S, s_total=S, ts=ts,
        need_mask=need_mask, acc_lanes=acc_lanes)

    return pl.pallas_call(
        kernel,
        out_shape=jax.ShapeDtypeStruct((NC, 1), jnp.float32),
        grid=(n_row, n_sp),
        in_specs=[pl.BlockSpec((tmr, ts), lambda i, j: (i, j))],
        out_specs=pl.BlockSpec((tmr, 1), lambda i, j: (i, 0)),
        scratch_shapes=[pltpu.VMEM((tmr, acc_lanes), jnp.float32),
                        pltpu.VMEM((tmr, acc_lanes), jnp.float32)],
        compiler_params=pltpu.CompilerParams(
            dimension_semantics=("parallel", "arbitrary"),
            vmem_limit_bytes=32 * 1024 * 1024),
        cost_estimate=pl.CostEstimate(
            flops=2 * NC * S,
            transcendentals=0,
            bytes_accessed=NC * S * itemsize + NC * 4),
    )(x2d)


# ---------------------------------------------------------------------------
# SEBlockMod.forward
# ---------------------------------------------------------------------------
def se_block_forward(x, params):
    """x: (N, C, D, H, W). params in PyTorch Linear convention:
       fc1_w: (C/r, C), fc1_b: (C/r,), fc2_w: (C, C/r), fc2_b: (C,).
       Returns (N, C, 1, 1, 1) sigmoid gates."""
    N, C, D, H, W = x.shape
    S = D * H * W

    x2d = x.reshape(N * C, S)                 # free (contiguous) view of NCDHW
    pooled = global_mean_plus_max(x2d)        # Pallas: one streaming pass over x
    z = pooled.reshape(N, C)

    # Few-KiB epilogue: fc1 -> ReLU -> fc2 -> sigmoid inlined as plain jnp (XLA fuses it);
    # a second pallas_call's fixed dispatch would dominate latency for modest inputs.
    hp = jax.lax.Precision.HIGHEST
    h = jnp.maximum(jnp.dot(z, params["fc1_w"].T, precision=hp) + params["fc1_b"], 0.0)
    y = jax.nn.sigmoid(jnp.dot(h, params["fc2_w"].T, precision=hp) + params["fc2_b"])
    return y.reshape(N, C, 1, 1, 1)


# ---------------------------------------------------------------------------
# Pure-JAX reference (pools computed along a different path than the kernel)
# ---------------------------------------------------------------------------
def reference_forward(x, params):
    mean = jnp.mean(x, axis=(2, 3, 4))
    mx = jnp.max(x, axis=(2, 3, 4))
    z = mean + mx
    hp = jax.lax.Precision.HIGHEST
    h = jnp.maximum(jnp.dot(z, params["fc1_w"].T, precision=hp) + params["fc1_b"], 0.0)
    y = jax.nn.sigmoid(jnp.dot(h, params["fc2_w"].T, precision=hp) + params["fc2_b"])
    return y.reshape(x.shape[0], x.shape[1], 1, 1, 1)


# ---------------------------------------------------------------------------
if __name__ == "__main__":
    key = jax.random.PRNGKey(0)
    N, C, r = 2, 32, 4
    D = H = W = 16
    Hmid = int(round(C / r))

    ks = jax.random.split(key, 5)
    x = jax.random.normal(ks[0], (N, C, D, H, W), jnp.float32)
    params = dict(
        fc1_w=0.05 * jax.random.normal(ks[1], (Hmid, C), jnp.float32),
        fc1_b=0.05 * jax.random.normal(ks[2], (Hmid,), jnp.float32),
        fc2_w=0.05 * jax.random.normal(ks[3], (C, Hmid), jnp.float32),
        fc2_b=0.05 * jax.random.normal(ks[4], (C,), jnp.float32),
    )

    y = jax.block_until_ready(jax.jit(se_block_forward)(x, params))

    assert y.shape == (N, C, 1, 1, 1)
    y_ref = reference_forward(x, params)
    np.testing.assert_allclose(np.asarray(y), np.asarray(y_ref), rtol=3e-3, atol=3e-3)
    print("KERNEL_OK")
</pallas_src>

<mosaic_0001>
module attributes {stable_mosaic.version = 11 : i64} {
  func.func @_pool_kernel(%arg0: i32, %arg1: i32, %arg2: memref<32x4096xf32, #tpu.memory_space<vmem>>, %arg3: memref<32x1xf32, #tpu.memory_space<vmem>>, %arg4: memref<32x128xf32, #tpu.memory_space<vmem>>, %arg5: memref<32x128xf32, #tpu.memory_space<vmem>>) attributes {dimension_semantics = [#tpu.dimension_semantics<parallel>, #tpu.dimension_semantics<arbitrary>], iteration_bounds = array<i64: 2, 1>, scalar_prefetch = 0 : i64, scratch_operands = 2 : i64, tpu.core_type = #tpu.core_type<tc>, window_params = [{transform_indices = @transform_0, window_bounds = array<i64: 32, 4096>}, {transform_indices = @transform_1, window_bounds = array<i64: 32, 1>}]} {
    %c0_i32 = arith.constant 0 : i32
    %0 = arith.cmpi eq, %arg1, %c0_i32 : i32
    %1 = arith.extui %0 : i1 to i32
    %c0_i32_0 = arith.constant 0 : i32
    %2 = arith.cmpi ne, %1, %c0_i32_0 : i32
    scf.if %2 {
      %cst = arith.constant 0.000000e+00 : f32
      %139 = vector.broadcast %cst : f32 to vector<32x128xf32>
      %c0_12 = arith.constant 0 : index
      %c0_13 = arith.constant 0 : index
      %140 = vector.load %arg4[%c0_12, %c0_13] : memref<32x128xf32, #tpu.memory_space<vmem>>, vector<32x128xf32>
      tpu.vector_store %arg4[%c0_12, %c0_13], %139 {strides = array<i32>} : memref<32x128xf32, #tpu.memory_space<vmem>>, vector<32x128xf32>,
      %cst_14 = arith.constant 0xFF800000 : f32
      %141 = vector.broadcast %cst_14 : f32 to vector<32x128xf32>
      %c0_15 = arith.constant 0 : index
      %c0_16 = arith.constant 0 : index
      %142 = vector.load %arg5[%c0_15, %c0_16] : memref<32x128xf32, #tpu.memory_space<vmem>>, vector<32x128xf32>
      tpu.vector_store %arg5[%c0_15, %c0_16], %141 {strides = array<i32>} : memref<32x128xf32, #tpu.memory_space<vmem>>, vector<32x128xf32>,
    } else {
    }
    %c0 = arith.constant 0 : index
    %c0_1 = arith.constant 0 : index
    %3 = vector.load %arg2[%c0, %c0_1] : memref<32x4096xf32, #tpu.memory_space<vmem>>, vector<32x4096xf32>
    %4 = vector.extract_strided_slice %3 {offsets = [0, 0], sizes = [32, 128], strides = [1, 1]} : vector<32x4096xf32> to vector<32x128xf32>
    %5 = vector.extract_strided_slice %3 {offsets = [0, 0], sizes = [32, 128], strides = [1, 1]} : vector<32x4096xf32> to vector<32x128xf32>
    %6 = vector.extract_strided_slice %3 {offsets = [0, 128], sizes = [32, 128], strides = [1, 1]} : vector<32x4096xf32> to vector<32x128xf32>
    %7 = arith.addf %4, %6 : vector<32x128xf32>
    %8 = vector.extract_strided_slice %3 {offsets = [0, 128], sizes = [32, 128], strides = [1, 1]} : vector<32x4096xf32> to vector<32x128xf32>
    %9 = arith.maximumf %5, %8 : vector<32x128xf32>
    %10 = vector.extract_strided_slice %3 {offsets = [0, 256], sizes = [32, 128], strides = [1, 1]} : vector<32x4096xf32> to vector<32x128xf32>
    %11 = arith.addf %7, %10 : vector<32x128xf32>
    %12 = vector.extract_strided_slice %3 {offsets = [0, 256], sizes = [32, 128], strides = [1, 1]} : vector<32x4096xf32> to vector<32x128xf32>
    %13 = arith.maximumf %9, %12 : vector<32x128xf32>
    %14 = vector.extract_strided_slice %3 {offsets = [0, 384], sizes = [32, 128], strides = [1, 1]} : vector<32x4096xf32> to vector<32x128xf32>
    %15 = arith.addf %11, %14 : vector<32x128xf32>
    %16 = vector.extract_strided_slice %3 {offsets = [0, 384], sizes = [32, 128], strides = [1, 1]} : vector<32x4096xf32> to vector<32x128xf32>
    %17 = arith.maximumf %13, %16 : vector<32x128xf32>
    %18 = vector.extract_strided_slice %3 {offsets = [0, 512], sizes = [32, 128], strides = [1, 1]} : vector<32x4096xf32> to vector<32x128xf32>
    %19 = arith.addf %15, %18 : vector<32x128xf32>
    %20 = vector.extract_strided_slice %3 {offsets = [0, 512], sizes = [32, 128], strides = [1, 1]} : vector<32x4096xf32> to vector<32x128xf32>
    %21 = arith.maximumf %17, %20 : vector<32x128xf32>
    %22 = vector.extract_strided_slice %3 {offsets = [0, 640], sizes = [32, 128], strides = [1, 1]} : vector<32x4096xf32> to vector<32x128xf32>
    %23 = arith.addf %19, %22 : vector<32x128xf32>
    %24 = vector.extract_strided_slice %3 {offsets = [0, 640], sizes = [32, 128], strides = [1, 1]} : vector<32x4096xf32> to vector<32x128xf32>
    %25 = arith.maximumf %21, %24 : vector<32x128xf32>
    %26 = vector.extract_strided_slice %3 {offsets = [0, 768], sizes = [32, 128], strides = [1, 1]} : vector<32x4096xf32> to vector<32x128xf32>
    %27 = arith.addf %23, %26 : vector<32x128xf32>
    %28 = vector.extract_strided_slice %3 {offsets = [0, 768], sizes = [32, 128], strides = [1, 1]} : vector<32x4096xf32> to vector<32x128xf32>
    %29 = arith.maximumf %25, %28 : vector<32x128xf32>
    %30 = vector.extract_strided_slice %3 {offsets = [0, 896], sizes = [32, 128], strides = [1, 1]} : vector<32x4096xf32> to vector<32x128xf32>
    %31 = arith.addf %27, %30 : vector<32x128xf32>
    %32 = vector.extract_strided_slice %3 {offsets = [0, 896], sizes = [32, 128], strides = [1, 1]} : vector<32x4096xf32> to vector<32x128xf32>
    %33 = arith.maximumf %29, %32 : vector<32x128xf32>
    %34 = vector.extract_strided_slice %3 {offsets = [0, 1024], sizes = [32, 128], strides = [1, 1]} : vector<32x4096xf32> to vector<32x128xf32>
    %35 = arith.addf %31, %34 : vector<32x128xf32>
    %36 = vector.extract_strided_slice %3 {offsets = [0, 1024], sizes = [32, 128], strides = [1, 1]} : vector<32x4096xf32> to vector<32x128xf32>
    %37 = arith.maximumf %33, %36 : vector<32x128xf32>
    %38 = vector.extract_strided_slice %3 {offsets = [0, 1152], sizes = [32, 128], strides = [1, 1]} : vector<32x4096xf32> to vector<32x128xf32>
    %39 = arith.addf %35, %38 : vector<32x128xf32>
    %40 = vector.extract_strided_slice %3 {offsets = [0, 1152], sizes = [32, 128], strides = [1, 1]} : vector<32x4096xf32> to vector<32x128xf32>
    %41 = arith.maximumf %37, %40 : vector<32x128xf32>
    %42 = vector.extract_strided_slice %3 {offsets = [0, 1280], sizes = [32, 128], strides = [1, 1]} : vector<32x4096xf32> to vector<32x128xf32>
    %43 = arith.addf %39, %42 : vector<32x128xf32>
    %44 = vector.extract_strided_slice %3 {offsets = [0, 1280], sizes = [32, 128], strides = [1, 1]} : vector<32x4096xf32> to vector<32x128xf32>
    %45 = arith.maximumf %41, %44 : vector<32x128xf32>
    %46 = vector.extract_strided_slice %3 {offsets = [0, 1408], sizes = [32, 128], strides = [1, 1]} : vector<32x4096xf32> to vector<32x128xf32>
    %47 = arith.addf %43, %46 : vector<32x128xf32>
    %48 = vector.extract_strided_slice %3 {offsets = [0, 1408], sizes = [32, 128], strides = [1, 1]} : vector<32x4096xf32> to vector<32x128xf32>
    %49 = arith.maximumf %45, %48 : vector<32x128xf32>
    %50 = vector.extract_strided_slice %3 {offsets = [0, 1536], sizes = [32, 128], strides = [1, 1]} : vector<32x4096xf32> to vector<32x128xf32>
    %51 = arith.addf %47, %50 : vector<32x128xf32>
    %52 = vector.extract_strided_slice %3 {offsets = [0, 1536], sizes = [32, 128], strides = [1, 1]} : vector<32x4096xf32> to vector<32x128xf32>
    %53 = arith.maximumf %49, %52 : vector<32x128xf32>
    %54 = vector.extract_strided_slice %3 {offsets = [0, 1664], sizes = [32, 128], strides = [1, 1]} : vector<32x4096xf32> to vector<32x128xf32>
    %55 = arith.addf %51, %54 : vector<32x128xf32>
    %56 = vector.extract_strided_slice %3 {offsets = [0, 1664], sizes = [32, 128], strides = [1, 1]} : vector<32x4096xf32> to vector<32x128xf32>
    %57 = arith.maximumf %53, %56 : vector<32x128xf32>
    %58 = vector.extract_strided_slice %3 {offsets = [0, 1792], sizes = [32, 128], strides = [1, 1]} : vector<32x4096xf32> to vector<32x128xf32>
    %59 = arith.addf %55, %58 : vector<32x128xf32>
    %60 = vector.extract_strided_slice %3 {offsets = [0, 1792], sizes = [32, 128], strides = [1, 1]} : vector<32x4096xf32> to vector<32x128xf32>
    %61 = arith.maximumf %57, %60 : vector<32x128xf32>
    %62 = vector.extract_strided_slice %3 {offsets = [0, 1920], sizes = [32, 128], strides = [1, 1]} : vector<32x4096xf32> to vector<32x128xf32>
    %63 = arith.addf %59, %62 : vector<32x128xf32>
    %64 = vector.extract_strided_slice %3 {offsets = [0, 1920], sizes = [32, 128], strides = [1, 1]} : vector<32x4096xf32> to vector<32x128xf32>
    %65 = arith.maximumf %61, %64 : vector<32x128xf32>
    %66 = vector.extract_strided_slice %3 {offsets = [0, 2048], sizes = [32, 128], strides = [1, 1]} : vector<32x4096xf32> to vector<32x128xf32>
    %67 = arith.addf %63, %66 : vector<32x128xf32>
    %68 = vector.extract_strided_slice %3 {offsets = [0, 2048], sizes = [32, 128], strides = [1, 1]} : vector<32x4096xf32> to vector<32x128xf32>
    %69 = arith.maximumf %65, %68 : vector<32x128xf32>
    %70 = vector.extract_strided_slice %3 {offsets = [0, 2176], sizes = [32, 128], strides = [1, 1]} : vector<32x4096xf32> to vector<32x128xf32>
    %71 = arith.addf %67, %70 : vector<32x128xf32>
    %72 = vector.extract_strided_slice %3 {offsets = [0, 2176], sizes = [32, 128], strides = [1, 1]} : vector<32x4096xf32> to vector<32x128xf32>
    %73 = arith.maximumf %69, %72 : vector<32x128xf32>
    %74 = vector.extract_strided_slice %3 {offsets = [0, 2304], sizes = [32, 128], strides = [1, 1]} : vector<32x4096xf32> to vector<32x128xf32>
    %75 = arith.addf %71, %74 : vector<32x128xf32>
    %76 = vector.extract_strided_slice %3 {offsets = [0, 2304], sizes = [32, 128], strides = [1, 1]} : vector<32x4096xf32> to vector<32x128xf32>
    %77 = arith.maximumf %73, %76 : vector<32x128xf32>
    %78 = vector.extract_strided_slice %3 {offsets = [0, 2432], sizes = [32, 128], strides = [1, 1]} : vector<32x4096xf32> to vector<32x128xf32>
    %79 = arith.addf %75, %78 : vector<32x128xf32>
    %80 = vector.extract_strided_slice %3 {offsets = [0, 2432], sizes = [32, 128], strides = [1, 1]} : vector<32x4096xf32> to vector<32x128xf32>
    %81 = arith.maximumf %77, %80 : vector<32x128xf32>
    %82 = vector.extract_strided_slice %3 {offsets = [0, 2560], sizes = [32, 128], strides = [1, 1]} : vector<32x4096xf32> to vector<32x128xf32>
    %83 = arith.addf %79, %82 : vector<32x128xf32>
    %84 = vector.extract_strided_slice %3 {offsets = [0, 2560], sizes = [32, 128], strides = [1, 1]} : vector<32x4096xf32> to vector<32x128xf32>
    %85 = arith.maximumf %81, %84 : vector<32x128xf32>
    %86 = vector.extract_strided_slice %3 {offsets = [0, 2688], sizes = [32, 128], strides = [1, 1]} : vector<32x4096xf32> to vector<32x128xf32>
    %87 = arith.addf %83, %86 : vector<32x128xf32>
    %88 = vector.extract_strided_slice %3 {offsets = [0, 2688], sizes = [32, 128], strides = [1, 1]} : vector<32x4096xf32> to vector<32x128xf32>
    %89 = arith.maximumf %85, %88 : vector<32x128xf32>
    %90 = vector.extract_strided_slice %3 {offsets = [0, 2816], sizes = [32, 128], strides = [1, 1]} : vector<32x4096xf32> to vector<32x128xf32>
    %91 = arith.addf %87, %90 : vector<32x128xf32>
    %92 = vector.extract_strided_slice %3 {offsets = [0, 2816], sizes = [32, 128], strides = [1, 1]} : vector<32x4096xf32> to vector<32x128xf32>
    %93 = arith.maximumf %89, %92 : vector<32x128xf32>
    %94 = vector.extract_strided_slice %3 {offsets = [0, 2944], sizes = [32, 128], strides = [1, 1]} : vector<32x4096xf32> to vector<32x128xf32>
    %95 = arith.addf %91, %94 : vector<32x128xf32>
    %96 = vector.extract_strided_slice %3 {offsets = [0, 2944], sizes = [32, 128], strides = [1, 1]} : vector<32x4096xf32> to vector<32x128xf32>
    %97 = arith.maximumf %93, %96 : vector<32x128xf32>
    %98 = vector.extract_strided_slice %3 {offsets = [0, 3072], sizes = [32, 128], strides = [1, 1]} : vector<32x4096xf32> to vector<32x128xf32>
    %99 = arith.addf %95, %98 : vector<32x128xf32>
    %100 = vector.extract_strided_slice %3 {offsets = [0, 3072], sizes = [32, 128], strides = [1, 1]} : vector<32x4096xf32> to vector<32x128xf32>
    %101 = arith.maximumf %97, %100 : vector<32x128xf32>
    %102 = vector.extract_strided_slice %3 {offsets = [0, 3200], sizes = [32, 128], strides = [1, 1]} : vector<32x4096xf32> to vector<32x128xf32>
    %103 = arith.addf %99, %102 : vector<32x128xf32>
    %104 = vector.extract_strided_slice %3 {offsets = [0, 3200], sizes = [32, 128], strides = [1, 1]} : vector<32x4096xf32> to vector<32x128xf32>
    %105 = arith.maximumf %101, %104 : vector<32x128xf32>
    %106 = vector.extract_strided_slice %3 {offsets = [0, 3328], sizes = [32, 128], strides = [1, 1]} : vector<32x4096xf32> to vector<32x128xf32>
    %107 = arith.addf %103, %106 : vector<32x128xf32>
    %108 = vector.extract_strided_slice %3 {offsets = [0, 3328], sizes = [32, 128], strides = [1, 1]} : vector<32x4096xf32> to vector<32x128xf32>
    %109 = arith.maximumf %105, %108 : vector<32x128xf32>
    %110 = vector.extract_strided_slice %3 {offsets = [0, 3456], sizes = [32, 128], strides = [1, 1]} : vector<32x4096xf32> to vector<32x128xf32>
    %111 = arith.addf %107, %110 : vector<32x128xf32>
    %112 = vector.extract_strided_slice %3 {offsets = [0, 3456], sizes = [32, 128], strides = [1, 1]} : vector<32x4096xf32> to vector<32x128xf32>
    %113 = arith.maximumf %109, %112 : vector<32x128xf32>
    %114 = vector.extract_strided_slice %3 {offsets = [0, 3584], sizes = [32, 128], strides = [1, 1]} : vector<32x4096xf32> to vector<32x128xf32>
    %115 = arith.addf %111, %114 : vector<32x128xf32>
    %116 = vector.extract_strided_slice %3 {offsets = [0, 3584], sizes = [32, 128], strides = [1, 1]} : vector<32x4096xf32> to vector<32x128xf32>
    %117 = arith.maximumf %113, %116 : vector<32x128xf32>
    %118 = vector.extract_strided_slice %3 {offsets = [0, 3712], sizes = [32, 128], strides = [1, 1]} : vector<32x4096xf32> to vector<32x128xf32>
    %119 = arith.addf %115, %118 : vector<32x128xf32>
    %120 = vector.extract_strided_slice %3 {offsets = [0, 3712], sizes = [32, 128], strides = [1, 1]} : vector<32x4096xf32> to vector<32x128xf32>
    %121 = arith.maximumf %117, %120 : vector<32x128xf32>
    %122 = vector.extract_strided_slice %3 {offsets = [0, 3840], sizes = [32, 128], strides = [1, 1]} : vector<32x4096xf32> to vector<32x128xf32>
    %123 = arith.addf %119, %122 : vector<32x128xf32>
    %124 = vector.extract_strided_slice %3 {offsets = [0, 3840], sizes = [32, 128], strides = [1, 1]} : vector<32x4096xf32> to vector<32x128xf32>
    %125 = arith.maximumf %121, %124 : vector<32x128xf32>
    %126 = vector.extract_strided_slice %3 {offsets = [0, 3968], sizes = [32, 128], strides = [1, 1]} : vector<32x4096xf32> to vector<32x128xf32>
    %127 = arith.addf %123, %126 : vector<32x128xf32>
    %128 = vector.extract_strided_slice %3 {offsets = [0, 3968], sizes = [32, 128], strides = [1, 1]} : vector<32x4096xf32> to vector<32x128xf32>
    %129 = arith.maximumf %125, %128 : vector<32x128xf32>
    %c0_2 = arith.constant 0 : index
    %c0_3 = arith.constant 0 : index
    %130 = vector.load %arg4[%c0_2, %c0_3] : memref<32x128xf32, #tpu.memory_space<vmem>>, vector<32x128xf32>
    %131 = arith.addf %130, %127 : vector<32x128xf32>
    %c0_4 = arith.constant 0 : index
    %c0_5 = arith.constant 0 : index
    %132 = vector.load %arg4[%c0_4, %c0_5] : memref<32x128xf32, #tpu.memory_space<vmem>>, vector<32x128xf32>
    tpu.vector_store %arg4[%c0_4, %c0_5], %131 {strides = array<i32>} : memref<32x128xf32, #tpu.memory_space<vmem>>, vector<32x128xf32>,
    %c0_6 = arith.constant 0 : index
    %c0_7 = arith.constant 0 : index
    %133 = vector.load %arg5[%c0_6, %c0_7] : memref<32x128xf32, #tpu.memory_space<vmem>>, vector<32x128xf32>
    %134 = arith.maximumf %133, %129 : vector<32x128xf32>
    %c0_8 = arith.constant 0 : index
    %c0_9 = arith.constant 0 : index
    %135 = vector.load %arg5[%c0_8, %c0_9] : memref<32x128xf32, #tpu.memory_space<vmem>>, vector<32x128xf32>
    tpu.vector_store %arg5[%c0_8, %c0_9], %134 {strides = array<i32>} : memref<32x128xf32, #tpu.memory_space<vmem>>, vector<32x128xf32>,
    %c0_i32_10 = arith.constant 0 : i32
    %136 = arith.cmpi eq, %arg1, %c0_i32_10 : i32
    %137 = arith.extui %136 : i1 to i32
    %c0_i32_11 = arith.constant 0 : i32
    %138 = arith.cmpi ne, %137, %c0_i32_11 : i32
    scf.if %138 {
      %c0_12 = arith.constant 0 : index
      %c0_13 = arith.constant 0 : index
      %139 = vector.load %arg4[%c0_12, %c0_13] : memref<32x128xf32, #tpu.memory_space<vmem>>, vector<32x128xf32>
      %cst = arith.constant dense<0.000000e+00> : vector<32xf32>
      %140 = vector.multi_reduction <add>, %139, %cst [1] : vector<32x128xf32> to vector<32xf32>
      %141 = vector.shape_cast %140 : vector<32xf32> to vector<32x1xf32>
      %cst_14 = arith.constant 2.44140625E-4 : f32
      %142 = vector.broadcast %cst_14 : f32 to vector<32x1xf32>
      %143 = arith.mulf %141, %142 : vector<32x1xf32>
      %c0_15 = arith.constant 0 : index
      %c0_16 = arith.constant 0 : index
      %144 = vector.load %arg5[%c0_15, %c0_16] : memref<32x128xf32, #tpu.memory_space<vmem>>, vector<32x128xf32>
      %cst_17 = arith.constant dense<0xFF800000> : vector<32xf32>
      %145 = vector.multi_reduction <maximumf>, %144, %cst_17 [1] : vector<32x128xf32> to vector<32xf32>
      %146 = vector.shape_cast %145 : vector<32xf32> to vector<32x1xf32>
      %147 = arith.addf %143, %146 : vector<32x1xf32>
      %c0_18 = arith.constant 0 : index
      %c0_19 = arith.constant 0 : index
      %148 = vector.load %arg3[%c0_18, %c0_19] : memref<32x1xf32, #tpu.memory_space<vmem>>, vector<32x1xf32>
      tpu.vector_store %arg3[%c0_18, %c0_19], %147 {strides = array<i32>} : memref<32x1xf32, #tpu.memory_space<vmem>>, vector<32x1xf32>,
    } else {
    }
    return
  }
  func.func @transform_0(%arg0: i32, %arg1: i32) -> (i32, i32) {
    %c0_i32 = arith.constant 0 : i32
    return %arg0, %arg1 : i32, i32
  }
  func.func @transform_1(%arg0: i32, %arg1: i32) -> (i32, i32) {
    %c0_i32 = arith.constant 0 : i32
    %c0_i32_0 = arith.constant 0 : i32
    return %arg0, %c0_i32 : i32, i32
  }
}

</mosaic_0001>

<bundles_post_ra>
// kernel: se_block_forward.1
= control target key start
LH: loop header
LB: loop body
LE: loop exit
PB: predicated region body
PF: predicated region fallthrough
CT: control target
= control target key end

     0   :  { %s745_s6 = smov 0   ;;  %s747_s7 = smov 0   ;;  %s975_s0 = inlined_call_operand.vmem [shape: f32[64,4096], index: 0, kind: input, shape index: {}]   ;;  %s976_s1 = inlined_call_operand.vmem [shape: f32[64,1], index: 1, kind: output, shape index: {}]  }
   0x1   :  { %s749_s8 = smov 0  }
   0x2 LB: > { %s23_s9 = sadd.s32 1, %s729_s7  ;;  %p678_p0 = scmp.ge.s32.totalorder %s733_s8, 1  ;;  %s733_s8 = sphi %s749_s8, %s11_s8   ;;  %s729_s7 = sphi %s747_s7, %s978_s7   ;;  %s725_s6 = sphi %s745_s6, %s977_s6  }
   0x3   : > { %p25_p1 = scmp.ge.s32.totalorder %s23_s9, 2  ;;  %p108_p2 = scmp.lt.s32.totalorder %s733_s8, 3 }
   0x5   : > { %s980_s9 = smov (%p25_p1, %s23_s9), 0  ;;  %p109_p3 = pnand %p678_p0, %p108_p2 }
   0x6   : > { %s679_s10 = sshll.u32 (!%p109_p3), %s725_s6, 2  ;;  %vm598_vm0 = vcmask (!%p109_p3), 7168  }
   0x7   : > { %112 = sbr.rel (%p109_p3) target bundleno = 255 (0xff), region = 24  ;;  %p135_p4 = scmp.lt.s32.totalorder (!%p109_p3), %s679_s10, 7 }
   0xe   : > { %s982_s10 = smov (!%p135_p4, %s679_s10), 7 }
   0xf   : > { %s686_s11 = sshll.u32 %s982_s10, 8  ;;  %s683_s15 = sshll.u32 %s982_s10, 3 }
  0x10   : > { %s769_s14 = scalar_lea.vmem %s975_s0, %s686_s11  ;;  %s149_s18 = scalar_lea.vmem %s976_s1, %s683_s15 }
  0x11   : > { %v772_v0 = vld [vmem:[%s769_s14 + $0x200] sm:$0xff]  ;;  %v775_v1 = vld [vmem:[%s769_s14 + $0x208] sm:$0xff]  ;;  %v229_v2 = vld [vmem:[%s769_s14 + $0x210] sm:$0xff] }
  0x12   : > { %v230_v3 = vld [vmem:[%s769_s14 + $0x218] sm:$0xff]  ;;  %v293_v4 = vadd.f32 %v775_v1, %v772_v0  ;;  %v297_v5 = vmax.f32 %v772_v0, %v775_v1  ;;  %v231_v7 = vld [vmem:[%s769_s14 + $0x220] sm:$0xff]  ;;  %v232_v10 = vld [vmem:[%s769_s14 + $0x228] sm:$0xff] }
  0x13   : > { %v305_v6 = vmax.f32 %v230_v3, %v229_v2  ;;  %v233_v13 = vld [vmem:[%s769_s14 + $0x230] sm:$0xff]  ;;  %v234_v16 = vld [vmem:[%s769_s14 + $0x238] sm:$0xff]  ;;  %v163_v19 = vld [vmem:[%s769_s14] sm:$0xff] }
  0x14   : > { %v301_v8 = vadd.f32 %v293_v4, %v229_v2  ;;  %v235_v20 = vld [vmem:[%s769_s14 + $0x240] sm:$0xff]  ;;  %v164_v22 = vld [vmem:[%s769_s14 + $0x8] sm:$0xff]  ;;  %v165_v23 = vld [vmem:[%s769_s14 + $0x10] sm:$0xff] }
  0x15   : > { %v313_v9 = vmax.f32 %v305_v6, %v231_v7  ;;  %v291_v25 = vadd.f32 %v164_v22, %v163_v19  ;;  %v295_v26 = vmax.f32 %v163_v19, %v164_v22  ;;  %v236_v27 = vld [vmem:[%s769_s14 + $0x248] sm:$0xff]  ;;  %v166_v29 = vld [vmem:[%s769_s14 + $0x18] sm:$0xff]  ;;  %v237_v33 = vld [vmem:[%s769_s14 + $0x250] sm:$0xff] }
  0x16   : > { %v309_v11 = vadd.f32 %v301_v8, %v230_v3  ;;  %v167_v35 = vld [vmem:[%s769_s14 + $0x20] sm:$0xff]  ;;  %v238_v39 = vld [vmem:[%s769_s14 + $0x258] sm:$0xff]  ;;  %v168_v41 = vld [vmem:[%s769_s14 + $0x28] sm:$0xff] }
  0x17   : > { %v321_v12 = vmax.f32 %v313_v9, %v232_v10  ;;  %v299_v31 = vadd.f32 %v291_v25, %v165_v23  ;;  %v303_v32 = vmax.f32 %v295_v26, %v165_v23  ;;  %v239_v45 = vld [vmem:[%s769_s14 + $0x260] sm:$0xff]  ;;  %v169_v47 = vld [vmem:[%s769_s14 + $0x30] sm:$0xff]  ;;  %v240_v49 = vld [vmem:[%s769_s14 + $0x268] sm:$0xff] }
  0x18   : > { %v317_v14 = vadd.f32 %v309_v11, %v231_v7  ;;  %v170_v53 = vld [vmem:[%s769_s14 + $0x38] sm:$0xff]  ;;  %v195_v54 = vld [vmem:[%s769_s14 + $0x100] sm:$0xff]  ;;  %v196_v55 = vld [vmem:[%s769_s14 + $0x108] sm:$0xff] }
  0x19   : > { %v329_v15 = vmax.f32 %v321_v12, %v233_v13  ;;  %v307_v37 = vadd.f32 %v299_v31, %v166_v29  ;;  %v311_v38 = vmax.f32 %v303_v32, %v166_v29  ;;  %v197_v59 = vld [vmem:[%s769_s14 + $0x110] sm:$0xff]  ;;  %v292_v60 = vadd.f32 %v196_v55, %v195_v54  ;;  %v171_v63 = vld [vmem:[%s769_s14 + $0x40] sm:$0xff]  ;;  %v198_v2 = vld [vmem:[%s769_s14 + $0x118] sm:$0xff] }
  0x1a   : > { %v325_v17 = vadd.f32 %v317_v14, %v232_v10  ;;  %v241_v61 = vld [vmem:[%s769_s14 + $0x270] sm:$0xff]  ;;  %v296_v3 = vmax.f32 %v195_v54, %v196_v55  ;;  %v242_v9 = vld [vmem:[%s769_s14 + $0x278] sm:$0xff]  ;;  %v172_v11 = vld [vmem:[%s769_s14 + $0x48] sm:$0xff] }
  0x1b   : > { %v337_v18 = vmax.f32 %v329_v15, %v234_v16  ;;  %v315_v43 = vadd.f32 %v307_v37, %v167_v35  ;;  %v319_v44 = vmax.f32 %v311_v38, %v167_v35  ;;  %v300_v8 = vadd.f32 %v292_v60, %v197_v59  ;;  %v199_v12 = vld [vmem:[%s769_s14 + $0x120] sm:$0xff]  ;;  %v173_v19 = vld [vmem:[%s769_s14 + $0x50] sm:$0xff]  ;;  %v244_v31 = vld [vmem:[%s769_s14 + $0x288] sm:$0xff] }
  0x1c   : > { %v333_v21 = vadd.f32 %v325_v17, %v233_v13  ;;  %v304_v13 = vmax.f32 %v296_v3, %v197_v59  ;;  %v243_v22 = vld [vmem:[%s769_s14 + $0x280] sm:$0xff]  ;;  %v245_v35 = vld [vmem:[%s769_s14 + $0x290] sm:$0xff]  ;;  %v202_v38 = vld [vmem:[%s769_s14 + $0x138] sm:$0xff] }
  0x1d   : > { %v345_v24 = vmax.f32 %v337_v18, %v235_v20  ;;  %v323_v50 = vadd.f32 %v315_v43, %v168_v41  ;;  %v327_v51 = vmax.f32 %v319_v44, %v168_v41  ;;  %v308_v17 = vadd.f32 %v300_v8, %v198_v2  ;;  %v175_v37 = vld [vmem:[%s769_s14 + $0x60] sm:$0xff]  ;;  %v260_v44 = vld [vmem:[%s769_s14 + $0x308] sm:$0xff]  ;;  %v177_v59 = vld [vmem:[%s769_s14 + $0x70] sm:$0xff] }
  0x1e   : > { %v341_v28 = vadd.f32 %v333_v21, %v234_v16  ;;  %v312_v21 = vmax.f32 %v304_v13, %v198_v2  ;;  %v259_v43 = vld [vmem:[%s769_s14 + $0x300] sm:$0xff]  ;;  %v204_v60 = vld [vmem:[%s769_s14 + $0x148] sm:$0xff] }
  0x1f   : > { %v353_v30 = vmax.f32 %v345_v24, %v236_v27  ;;  %v331_v57 = vadd.f32 %v323_v50, %v169_v47  ;;  %v335_v58 = vmax.f32 %v327_v51, %v169_v47  ;;  %v316_v25 = vadd.f32 %v308_v17, %v199_v12  ;;  %v176_v47 = vld [vmem:[%s769_s14 + $0x68] sm:$0xff]  ;;  %v247_v2 = vld [vmem:[%s769_s14 + $0x2a0] sm:$0xff] }
  0x20   : > { %v349_v34 = vadd.f32 %v341_v28, %v235_v20  ;;  %v200_v20 = vld [vmem:[%s769_s14 + $0x128] sm:$0xff]  ;;  %v201_v28 = vld [vmem:[%s769_s14 + $0x130] sm:$0xff]  ;;  %v320_v29 = vmax.f32 %v312_v21, %v199_v12  ;;  %v294_v50 = vadd.f32 %v260_v44, %v259_v43  ;;  %v298_v51 = vmax.f32 %v259_v43, %v260_v44  ;;  %v179_v21 = vld [vmem:[%s769_s14 + $0x80] sm:$0xff] }
  0x21   : > { %v361_v36 = vmax.f32 %v353_v30, %v237_v33  ;;  %v339_v6 = vadd.f32 %v331_v57, %v170_v53  ;;  %v343_v7 = vmax.f32 %v335_v58, %v170_v53  ;;  %v825_v53 = vld [vmem:[%s769_s14 + $0x298] sm:$0xff]  ;;  %v181_v44 = vld [vmem:[%s769_s14 + $0x90] sm:$0xff] }
  0x22   : > { %v357_v40 = vadd.f32 %v349_v34, %v236_v27  ;;  %v174_v27 = vld [vmem:[%s769_s14 + $0x58] sm:$0xff]  ;;  %v324_v34 = vadd.f32 %v316_v25, %v200_v20 }
  0x23   : > { %v369_v42 = vmax.f32 %v361_v36, %v238_v39  ;;  %v347_v15 = vadd.f32 %v339_v6, %v171_v63  ;;  %v351_v16 = vmax.f32 %v343_v7, %v171_v63  ;;  %v262_v57 = vld [vmem:[%s769_s14 + $0x318] sm:$0xff]  ;;  %v263_v7 = vld [vmem:[%s769_s14 + $0x320] sm:$0xff] }
  0x24   : > { %v365_v46 = vadd.f32 %v357_v40, %v237_v33 }
  0x25   : > { %v377_v48 = vmax.f32 %v369_v42, %v239_v45  ;;  %v355_v23 = vadd.f32 %v347_v15, %v172_v11  ;;  %v359_v24 = vmax.f32 %v351_v16, %v172_v11  ;;  %v332_v42 = vadd.f32 %v324_v34, %v201_v28  ;;  %v836_v15 = vld [vmem:[%s769_s14 + $0x2a8] sm:$0xff] }
  0x26   : > { %v373_v52 = vadd.f32 %v365_v46, %v238_v39  ;;  %v328_v39 = vmax.f32 %v320_v29, %v200_v20 }
  0x27   : > { %v385_v56 = vmax.f32 %v377_v48, %v240_v49  ;;  %v363_v32 = vadd.f32 %v355_v23, %v173_v19  ;;  %v367_v33 = vmax.f32 %v359_v24, %v173_v19  ;;  %v203_v48 = vld [vmem:[%s769_s14 + $0x140] sm:$0xff]  ;;  %v264_v19 = vld [vmem:[%s769_s14 + $0x328] sm:$0xff] }
  0x28   : > { %v381_v62 = vadd.f32 %v373_v52, %v239_v45  ;;  %v261_v45 = vld [vmem:[%s769_s14 + $0x310] sm:$0xff] }
  0x29   : > { %v393_v4 = vmax.f32 %v385_v56, %v241_v61  ;;  %v371_v40 = vadd.f32 %v363_v32, %v174_v27  ;;  %v375_v41 = vmax.f32 %v367_v33, %v174_v27  ;;  %v340_v56 = vadd.f32 %v332_v42, %v202_v38  ;;  %v180_v32 = vld [vmem:[%s769_s14 + $0x88] sm:$0xff]  ;;  %v207_v33 = vld [vmem:[%s769_s14 + $0x160] sm:$0xff]  ;;  %v266_v42 = vld [vmem:[%s769_s14 + $0x338] sm:$0xff] }
  0x2a   : > { %v389_v10 = vadd.f32 %v381_v62, %v240_v49  ;;  %v336_v49 = vmax.f32 %v328_v39, %v201_v28  ;;  %v302_v62 = vadd.f32 %v294_v50, %v261_v45  ;;  %v306_v63 = vmax.f32 %v298_v51, %v261_v45  ;;  %v208_v45 = vld [vmem:[%s769_s14 + $0x168] sm:$0xff] }
  0x2b   : > { %v401_v14 = vmax.f32 %v393_v4, %v242_v9  ;;  %v379_v54 = vadd.f32 %v371_v40, %v175_v37  ;;  %v383_v55 = vmax.f32 %v375_v41, %v175_v37  ;;  %v348_v6 = vadd.f32 %v340_v56, %v203_v48  ;;  %v209_v56 = vld [vmem:[%s769_s14 + $0x170] sm:$0xff] }
  0x2c   : > { %v397_v18 = vadd.f32 %v389_v10, %v241_v61  ;;  %v344_v61 = vmax.f32 %v336_v49, %v202_v38  ;;  %v205_v10 = vld [vmem:[%s769_s14 + $0x150] sm:$0xff]  ;;  %v310_v12 = vadd.f32 %v302_v62, %v262_v57  ;;  %v314_v13 = vmax.f32 %v306_v63, %v262_v57  ;;  %v850_v38 = vld [vmem:[%s769_s14 + $0x2b8] sm:$0xff]  ;;  %v857_v49 = vld [vmem:[%s769_s14 + $0x2c0] sm:$0xff] }
  0x2d   : > { %v409_v30 = vmax.f32 %v401_v14, %v243_v22  ;;  %v387_v3 = vadd.f32 %v379_v54, %v176_v47  ;;  %v391_v4 = vmax.f32 %v383_v55, %v176_v47  ;;  %v182_v55 = vld [vmem:[%s769_s14 + $0x98] sm:$0xff] }
  0x2e   : > { %v405_v26 = vadd.f32 %v397_v18, %v242_v9  ;;  %v178_v9 = vld [vmem:[%s769_s14 + $0x78] sm:$0xff]  ;;  %v352_v11 = vmax.f32 %v344_v61, %v203_v48  ;;  %v356_v18 = vadd.f32 %v348_v6, %v204_v60  ;;  %v318_v24 = vadd.f32 %v310_v12, %v263_v7  ;;  %v864_v61 = vld [vmem:[%s769_s14 + $0x2c8] sm:$0xff]  ;;  %v871_v12 = vld [vmem:[%s769_s14 + $0x2d0] sm:$0xff] }
  0x2f   : > { %v417_v52 = vmax.f32 %v409_v30, %v244_v31  ;;  %v395_v16 = vadd.f32 %v387_v3, %v177_v59  ;;  %v399_v17 = vmax.f32 %v391_v4, %v177_v59  ;;  %v322_v25 = vmax.f32 %v314_v13, %v263_v7  ;;  %v265_v30 = vld [vmem:[%s769_s14 + $0x330] sm:$0xff]  ;;  %v268_v4 = vld [vmem:[%s769_s14 + $0x348] sm:$0xff]  ;;  %v183_v7 = vld [vmem:[%s769_s14 + $0xa0] sm:$0xff] }
  0x30   : > { %v413_v36 = vadd.f32 %v405_v26, %v243_v22  ;;  %v206_v22 = vld [vmem:[%s769_s14 + $0x158] sm:$0xff]  ;;  %v360_v23 = vmax.f32 %v352_v11, %v204_v60  ;;  %v842_v26 = vld [vmem:[%s769_s14 + $0x2b0] sm:$0xff]  ;;  %v364_v29 = vadd.f32 %v356_v18, %v205_v10  ;;  %v184_v18 = vld [vmem:[%s769_s14 + $0xa8] sm:$0xff] }
  0x31   : > { %v425_v14 = vmax.f32 %v417_v52, %v245_v35  ;;  %v403_v27 = vadd.f32 %v395_v16, %v178_v9  ;;  %v407_v28 = vmax.f32 %v399_v17, %v178_v9  ;;  %v269_v16 = vld [vmem:[%s769_s14 + $0x350] sm:$0xff] }
  0x32   : > { %v421_v46 = vadd.f32 %v413_v36, %v244_v31  ;;  %v368_v34 = vmax.f32 %v360_v23, %v205_v10  ;;  %v330_v36 = vmax.f32 %v322_v25, %v264_v19  ;;  %v372_v41 = vadd.f32 %v364_v29, %v206_v22  ;;  %v270_v29 = vld [vmem:[%s769_s14 + $0x358] sm:$0xff] }
  0x33   : > { %v433_v37 = vmax.f32 %v425_v14, %v825_v53  ;;  %v411_v39 = vadd.f32 %v403_v27, %v179_v21  ;;  %v415_v40 = vmax.f32 %v407_v28, %v179_v21 }
  0x34   : > { %v429_v58 = vadd.f32 %v421_v46, %v245_v35  ;;  %v326_v35 = vadd.f32 %v318_v24, %v264_v19  ;;  %v376_v46 = vmax.f32 %v368_v34, %v206_v22  ;;  %v338_v48 = vmax.f32 %v330_v36, %v265_v30  ;;  %v211_v19 = vld [vmem:[%s769_s14 + $0x180] sm:$0xff]  ;;  %v879_v24 = vld [vmem:[%s769_s14 + $0x2d8] sm:$0xff] }
  0x35   : > { %v419_v50 = vadd.f32 %v411_v39, %v180_v32  ;;  %v423_v51 = vmax.f32 %v415_v40, %v180_v32  ;;  %v380_v52 = vadd.f32 %v372_v41, %v207_v33  ;;  %v441_v60 = vmax.f32 %v433_v37, %v247_v2  ;;  %v212_v32 = vld [vmem:[%s769_s14 + $0x188] sm:$0xff]  ;;  %v886_v36 = vld [vmem:[%s769_s14 + $0x2e0] sm:$0xff] }
  0x36   : > { %v437_v8 = vadd.f32 %v429_v58, %v825_v53  ;;  %v334_v47 = vadd.f32 %v326_v35, %v265_v30  ;;  %v267_v53 = vld [vmem:[%s769_s14 + $0x340] sm:$0xff]  ;;  %v384_v57 = vmax.f32 %v376_v46, %v207_v33  ;;  %v346_v59 = vmax.f32 %v338_v48, %v266_v42  ;;  %v894_v48 = vld [vmem:[%s769_s14 + $0x2e8] sm:$0xff] }
  0x37   : > { %v427_v62 = vadd.f32 %v419_v50, %v181_v44  ;;  %v431_v63 = vmax.f32 %v423_v51, %v181_v44  ;;  %v388_v3 = vadd.f32 %v380_v52, %v208_v45  ;;  %v449_v23 = vmax.f32 %v441_v60, %v836_v15  ;;  %v271_v40 = vld [vmem:[%s769_s14 + $0x360] sm:$0xff]  ;;  %v901_v60 = vld [vmem:[%s769_s14 + $0x2f0] sm:$0xff] }
  0x38   : > { %v445_v20 = vadd.f32 %v437_v8, %v247_v2  ;;  %v342_v58 = vadd.f32 %v334_v47, %v266_v42  ;;  %v210_v8 = vld [vmem:[%s769_s14 + $0x178] sm:$0xff]  ;;  %v392_v9 = vmax.f32 %v384_v57, %v208_v45  ;;  %v354_v11 = vmax.f32 %v346_v59, %v267_v53 }
  0x39   : > { %v435_v2 = vadd.f32 %v427_v62, %v182_v55  ;;  %v439_v13 = vmax.f32 %v431_v63, %v182_v55  ;;  %v396_v14 = vadd.f32 %v388_v3, %v209_v56  ;;  %v186_v42 = vld [vmem:[%s769_s14 + $0xb8] sm:$0xff]  ;;  %v457_v47 = vmax.f32 %v449_v23, %v842_v26  ;;  %v187_v55 = vld [vmem:[%s769_s14 + $0xc0] sm:$0xff]  ;;  %v273_v3 = vld [vmem:[%s769_s14 + $0x370] sm:$0xff] }
  0x3a   : > { %v453_v31 = vadd.f32 %v445_v20, %v836_v15  ;;  %v350_v10 = vadd.f32 %v342_v58, %v267_v53  ;;  %v400_v20 = vmax.f32 %v392_v9, %v209_v56  ;;  %v362_v22 = vmax.f32 %v354_v11, %v268_v4  ;;  %v272_v53 = vld [vmem:[%s769_s14 + $0x368] sm:$0xff]  ;;  %v214_v56 = vld [vmem:[%s769_s14 + $0x198] sm:$0xff] }
  0x3b   : > { %v443_v25 = vadd.f32 %v435_v2, %v183_v7  ;;  %v447_v27 = vmax.f32 %v439_v13, %v183_v7  ;;  %v404_v28 = vadd.f32 %v396_v14, %v210_v8  ;;  %v215_v7 = vld [vmem:[%s769_s14 + $0x1a0] sm:$0xff]  ;;  %v465_v11 = vmax.f32 %v457_v47, %v850_v38  ;;  %v909_v2 = vld [vmem:[%s769_s14 + $0x2f8] sm:$0xff] }
  0x3c   : > { %v461_v43 = vadd.f32 %v453_v31, %v842_v26  ;;  %v358_v21 = vadd.f32 %v350_v10, %v268_v4  ;;  %v185_v31 = vld [vmem:[%s769_s14 + $0xb0] sm:$0xff]  ;;  %v408_v33 = vmax.f32 %v400_v20, %v210_v8  ;;  %v370_v35 = vmax.f32 %v362_v22, %v269_v16  ;;  %v216_v20 = vld [vmem:[%s769_s14 + $0x1a8] sm:$0xff] }
  0x3d   : > { %v451_v15 = vadd.f32 %v443_v25, %v184_v18  ;;  %v455_v37 = vmax.f32 %v447_v27, %v184_v18  ;;  %v412_v39 = vadd.f32 %v404_v28, %v211_v19  ;;  %v275_v28 = vld [vmem:[%s769_s14 + $0x380] sm:$0xff] }
  0x3e   : > { %v469_v54 = vadd.f32 %v461_v43, %v850_v38  ;;  %v366_v34 = vadd.f32 %v358_v21, %v269_v16  ;;  %v213_v43 = vld [vmem:[%s769_s14 + $0x190] sm:$0xff]  ;;  %v416_v44 = vmax.f32 %v408_v33, %v211_v19  ;;  %v378_v46 = vmax.f32 %v370_v35, %v270_v29 }
  0x3f   : > { %v459_v50 = vadd.f32 %v451_v15, %v185_v31  ;;  %v463_v51 = vmax.f32 %v455_v37, %v185_v31  ;;  %v420_v52 = vadd.f32 %v412_v39, %v212_v32  ;;  %v189_v19 = vld [vmem:[%s769_s14 + $0xd0] sm:$0xff]  ;;  %v276_v39 = vld [vmem:[%s769_s14 + $0x388] sm:$0xff] }
  0x40   : > { %v477_v6 = vadd.f32 %v469_v54, %v857_v49  ;;  %v374_v45 = vadd.f32 %v366_v34, %v270_v29  ;;  %v424_v57 = vmax.f32 %v416_v44, %v212_v32  ;;  %v386_v59 = vmax.f32 %v378_v46, %v271_v40  ;;  %v217_v31 = vld [vmem:[%s769_s14 + $0x1b0] sm:$0xff] }
  0x41   : > { %v467_v26 = vadd.f32 %v459_v50, %v186_v42  ;;  %v471_v62 = vmax.f32 %v463_v51, %v186_v42  ;;  %v428_v63 = vadd.f32 %v420_v52, %v213_v43  ;;  %v218_v42 = vld [vmem:[%s769_s14 + $0x1b8] sm:$0xff]  ;;  %v277_v51 = vld [vmem:[%s769_s14 + $0x390] sm:$0xff]  ;;  %v192_v52 = vld [vmem:[%s769_s14 + $0xe8] sm:$0xff] }
  0x42   : > { %v485_v17 = vadd.f32 %v477_v6, %v864_v61  ;;  %v382_v58 = vadd.f32 %v374_v45, %v271_v40  ;;  %v188_v6 = vld [vmem:[%s769_s14 + $0xc8] sm:$0xff]  ;;  %v432_v8 = vmax.f32 %v424_v57, %v213_v43  ;;  %v394_v10 = vmax.f32 %v386_v59, %v272_v53  ;;  %v278_v59 = vld [vmem:[%s769_s14 + $0x398] sm:$0xff] }
  0x43   : > { %v475_v13 = vadd.f32 %v467_v26, %v187_v55  ;;  %v479_v14 = vmax.f32 %v471_v62, %v187_v55  ;;  %v436_v16 = vadd.f32 %v428_v63, %v214_v56  ;;  %v473_v40 = vmax.f32 %v465_v11, %v857_v49  ;;  %v193_v62 = vld [vmem:[%s769_s14 + $0xf0] sm:$0xff]  ;;  %v220_v63 = vld [vmem:[%s769_s14 + $0x1c8] sm:$0xff]  ;;  %v194_v11 = vld [vmem:[%s769_s14 + $0xf8] sm:$0xff] }
  0x44   : > { %v493_v30 = vadd.f32 %v485_v17, %v871_v12  ;;  %v390_v9 = vadd.f32 %v382_v58, %v272_v53  ;;  %v274_v17 = vld [vmem:[%s769_s14 + $0x378] sm:$0xff]  ;;  %v440_v21 = vmax.f32 %v432_v8, %v214_v56  ;;  %v402_v23 = vmax.f32 %v394_v10, %v273_v3  ;;  %v219_v53 = vld [vmem:[%s769_s14 + $0x1c0] sm:$0xff] }
  0x45   : > { %v483_v25 = vadd.f32 %v475_v13, %v188_v6  ;;  %v487_v27 = vmax.f32 %v479_v14, %v188_v6  ;;  %v444_v38 = vadd.f32 %v436_v16, %v215_v7  ;;  %v481_v26 = vmax.f32 %v473_v40, %v864_v61  ;;  %v279_v10 = vld [vmem:[%s769_s14 + $0x3a0] sm:$0xff]  ;;  %v221_v13 = vld [vmem:[%s769_s14 + $0x1d0] sm:$0xff] }
  0x46   : > { %v501_v41 = vadd.f32 %v493_v30, %v879_v24  ;;  %v398_v22 = vadd.f32 %v390_v9, %v273_v3  ;;  %v190_v30 = vld [vmem:[%s769_s14 + $0xd8] sm:$0xff]  ;;  %v448_v32 = vmax.f32 %v440_v21, %v215_v7  ;;  %v410_v34 = vmax.f32 %v402_v23, %v274_v17 }
  0x47   : > { %v491_v35 = vadd.f32 %v483_v25, %v189_v19  ;;  %v495_v15 = vmax.f32 %v487_v27, %v189_v19  ;;  %v452_v37 = vadd.f32 %v444_v38, %v216_v20  ;;  %v489_v21 = vmax.f32 %v481_v26, %v871_v12 }
  0x48   : > { %v509_v54 = vadd.f32 %v501_v41, %v886_v36  ;;  %v406_v33 = vadd.f32 %v398_v22, %v274_v17  ;;  %v191_v41 = vld [vmem:[%s769_s14 + $0xe0] sm:$0xff]  ;;  %v456_v43 = vmax.f32 %v448_v32, %v216_v20  ;;  %v418_v45 = vmax.f32 %v410_v34, %v275_v28  ;;  %v280_v20 = vld [vmem:[%s769_s14 + $0x3a8] sm:$0xff]  ;;  %v222_v22 = vld [vmem:[%s769_s14 + $0x1d8] sm:$0xff] }
  0x49   : > { %v499_v46 = vadd.f32 %v491_v35, %v190_v30  ;;  %v503_v47 = vmax.f32 %v495_v15, %v190_v30  ;;  %v460_v50 = vadd.f32 %v452_v37, %v217_v31  ;;  %v281_v30 = vld [vmem:[%s769_s14 + $0x3b0] sm:$0xff]  ;;  %v282_v35 = vld [vmem:[%s769_s14 + $0x3b8] sm:$0xff]  ;;  %v497_v15 = vmax.f32 %v489_v21, %v879_v24  ;;  %v224_v37 = vld [vmem:[%s769_s14 + $0x1e8] sm:$0xff] }
  0x4a   : > { %v517_v4 = vadd.f32 %v509_v54, %v894_v48  ;;  %v414_v44 = vadd.f32 %v406_v33, %v275_v28  ;;  %v464_v54 = vmax.f32 %v456_v43, %v217_v31  ;;  %v426_v49 = vmax.f32 %v418_v45, %v276_v39  ;;  %v223_v31 = vld [vmem:[%s769_s14 + $0x1e0] sm:$0xff] }
  0x4b   : > { %v507_v56 = vadd.f32 %v499_v46, %v191_v41  ;;  %v511_v57 = vmax.f32 %v503_v47, %v191_v41  ;;  %v468_v58 = vadd.f32 %v460_v50, %v218_v42  ;;  %v283_v43 = vld [vmem:[%s769_s14 + $0x3c0] sm:$0xff] }
  0x4c   : > { %v525_v18 = vadd.f32 %v517_v4, %v901_v60  ;;  %v422_v55 = vadd.f32 %v414_v44, %v276_v39  ;;  %v472_v3 = vmax.f32 %v464_v54, %v218_v42  ;;  %v434_v6 = vmax.f32 %v426_v49, %v277_v51  ;;  %v225_v44 = vld [vmem:[%s769_s14 + $0x1f0] sm:$0xff] }
  0x4d   : > { %v515_v7 = vadd.f32 %v507_v56, %v192_v52  ;;  %v519_v8 = vmax.f32 %v511_v57, %v192_v52  ;;  %v476_v9 = vadd.f32 %v468_v58, %v219_v53  ;;  %v505_v52 = vmax.f32 %v497_v15, %v886_v36  ;;  %v285_v56 = vld [vmem:[%s769_s14 + $0x3d0] sm:$0xff] }
  0x4e   : > { %v533_v29 = vadd.f32 %v525_v18, %v909_v2  ;;  %v430_v4 = vadd.f32 %v422_v55, %v277_v51  ;;  %v480_v14 = vmax.f32 %v472_v3, %v219_v53  ;;  %v442_v17 = vmax.f32 %v434_v6, %v278_v59  ;;  %v284_v51 = vld [vmem:[%s769_s14 + $0x3c8] sm:$0xff]  ;;  %v226_v53 = vld [vmem:[%s769_s14 + $0x1f8] sm:$0xff]  ;;  %v287_v6 = vld [vmem:[%s769_s14 + $0x3e0] sm:$0xff] }
  0x4f   : > { %v523_v18 = vadd.f32 %v515_v7, %v193_v62  ;;  %v527_v61 = vmax.f32 %v519_v8, %v193_v62  ;;  %v484_v19 = vadd.f32 %v476_v9, %v220_v63  ;;  %v286_v62 = vld [vmem:[%s769_s14 + $0x3d8] sm:$0xff]  ;;  %v288_v9 = vld [vmem:[%s769_s14 + $0x3e8] sm:$0xff] }
  0x50   : > { %574 = vadd.xlane.f32.xlu1 %v533_v29  ;;  %v438_v16 = vadd.f32 %v430_v4, %v278_v59  ;;  %v488_v23 = vmax.f32 %v480_v14, %v220_v63  ;;  %v450_v27 = vmax.f32 %v442_v17, %v279_v10  ;;  %v513_v63 = vmax.f32 %v505_v52, %v894_v48  ;;  %v289_v14 = vld [vmem:[%s769_s14 + $0x3f0] sm:$0xff] }
  0x51   : > { %v531_v38 = vadd.f32 %v523_v18, %v194_v11  ;;  %v535_v28 = vmax.f32 %v527_v61, %v194_v11  ;;  %v492_v29 = vadd.f32 %v484_v19, %v221_v13  ;;  %v290_v18 = vld [vmem:[%s769_s14 + $0x3f8] sm:$0xff] }
  0x52   : > { %v446_v25 = vadd.f32 %v438_v16, %v279_v10  ;;  %v496_v32 = vmax.f32 %v488_v23, %v221_v13  ;;  %v458_v34 = vmax.f32 %v450_v27, %v280_v20  ;;  %v521_v10 = vmax.f32 %v513_v63, %v901_v60 }
  0x53   : > { %570 = vadd.xlane.f32.xlu0 %v531_v38  ;;  %v500_v12 = vadd.f32 %v492_v29, %v222_v22 }
  0x54   : > { %v454_v33 = vadd.f32 %v446_v25, %v280_v20  ;;  %586 = vmax.xlane.f32.xlu1 %v535_v28  ;;  %v504_v39 = vmax.f32 %v496_v32, %v222_v22  ;;  %v466_v41 = vmax.f32 %v458_v34, %v281_v30  ;;  %v529_v48 = vmax.f32 %v521_v10, %v909_v2 }
  0x55   : > { %v508_v42 = vadd.f32 %v500_v12, %v223_v31 }
  0x56   : > { %v462_v40 = vadd.f32 %v454_v33, %v281_v30  ;;  %v512_v45 = vmax.f32 %v504_v39, %v223_v31  ;;  %v474_v47 = vmax.f32 %v466_v41, %v282_v35  ;;  %v537_v22 = vmax.f32 %v529_v48, %v297_v5 }
  0x57   : > { %v516_v50 = vadd.f32 %v508_v42, %v224_v37 }
  0x58   : > { %v470_v46 = vadd.f32 %v462_v40, %v282_v35  ;;  %v520_v54 = vmax.f32 %v512_v45, %v224_v37  ;;  %v482_v55 = vmax.f32 %v474_v47, %v283_v43 }
  0x59   : > { %v524_v49 = vadd.f32 %v516_v50, %v225_v44 }
  0x5a   : > { %v478_v24 = vadd.f32 %v470_v46, %v283_v43  ;;  %v528_v57 = vmax.f32 %v520_v54, %v225_v44  ;;  %v490_v59 = vmax.f32 %v482_v55, %v284_v51 }
  0x5b   : > { %v532_v26 = vadd.f32 %v524_v49, %v226_v53 }
  0x5c   : > { %v486_v58 = vadd.f32 %v478_v24, %v284_v51  ;;  %v536_v3 = vmax.f32 %v528_v57, %v226_v53  ;;  %v498_v36 = vmax.f32 %v490_v59, %v285_v56 }
  0x5d   : > { %572 = vadd.xlane.f32.xlu0 %v532_v26 }
  0x5e   : > { %v494_v4 = vadd.f32 %v486_v58, %v285_v56  ;;  %588 = vmax.xlane.f32.xlu1 %v536_v3  ;;  %v506_v8 = vmax.f32 %v498_v36, %v286_v62 }
  0x60   : > { %v502_v7 = vadd.f32 %v494_v4, %v286_v62  ;;  %v514_v13 = vmax.f32 %v506_v8, %v287_v6 }
  0x62   : > { %v510_v11 = vadd.f32 %v502_v7, %v287_v6  ;;  %v522_v17 = vmax.f32 %v514_v13, %v288_v9 }
  0x64   : > { %v518_v16 = vadd.f32 %v510_v11, %v288_v9  ;;  %v530_v19 = vmax.f32 %v522_v17, %v289_v14 }
  0x66   : > { %v526_v61 = vadd.f32 %v518_v16, %v289_v14  ;;  %v538_v21 = vmax.f32 %v530_v19, %v290_v18 }
  0x68   : > { %v534_v20 = vadd.f32 %v526_v61, %v290_v18  ;;  %592 = vmax.xlane.f32.xlu1 %v538_v21 }
  0x6a   : > { %576 = vadd.xlane.f32.xlu0 %v534_v20 }
  0x6e   : > { %590 = vmax.xlane.f32.xlu0 %v537_v22 }
  0xdd   : > { %v575_v60 = vpop.xlane.xlu1 %574 }
  0xde   : > { %v580_v31 = vmul.f32 0.00024414063, %v575_v60 }
  0xe0   : > { %v571_v23 = vpop.xlane.xlu0 %570 }
  0xe1   : > { %v587_v25 = vpop.xlane.xlu1 %586  ;;  %v578_v27 = vmul.f32 0.00024414063, %v571_v23 }
  0xe3   : > { %v594_v2 = vadd.f32 %v587_v25, %v578_v27 }
  0xe5   : > { %599 = vst.msk [vmem:[%s149_s18] sm:$0xff] %vm598_vm0, %v594_v2 }
  0xea   : > { %v573_v38 = vpop.xlane.xlu0 %572 }
  0xeb   : > { %v579_v28 = vmul.f32 0.00024414063, %v573_v38  ;;  %v589_v29 = vpop.xlane.xlu1 %588 }
  0xed   : > { %v595_v30 = vadd.f32 %v589_v29, %v579_v28 }
  0xef   : > { %600 = vst.msk [vmem:[%s149_s18 + $0x8] sm:$0xff] %vm598_vm0, %v595_v30 }
  0xf5   : > { %v593_v1 = vpop.xlane.xlu1 %592 }
  0xf7   : > { %v577_v0 = vpop.xlane.xlu0 %576 }
  0xf8   : > { %v581_v5 = vmul.f32 0.00024414063, %v577_v0 }
  0xfa   : > { %v597_v32 = vadd.f32 %v593_v1, %v581_v5 }
  0xfb   : > { %v591_v33 = vpop.xlane.xlu0 %590 }
  0xfc   : > { %v596_v34 = vadd.f32 %v591_v33, %v580_v31  ;;  %602 = vst.msk [vmem:[%s149_s18 + $0x18] sm:$0xff] %vm598_vm0, %v597_v32 }
  0xfe   : > { %601 = vst.msk [vmem:[%s149_s18 + $0x10] sm:$0xff] %vm598_vm0, %v596_v34 }
  0xff PF: > { %s11_s8 = sadd.s32 1, %s733_s8   ;;  %s977_s6 = smov %s729_s7 }
 0x100   : > { %p8_p5 = scmp.ge.s32.totalorder %s11_s8, 4   ;;  %s978_s7 = smov %s980_s9 }
 0x102   :  { %10 = sbr.rel (!%p8_p5) target bundleno = 2 (0x2), region = 62 }

</bundles_post_ra>
